<compile_context>
chip_gen: v5e
topology: v5e:2x2
jax: 0.10.0
libtpu: 0.0.40
codegen_flags: <defaults>
</compile_context>

<pallas_src>
import functools

import jax
import jax.numpy as jnp
from jax.experimental import pallas as pl
from jax.experimental.pallas import tpu as pltpu

LANE = 128  # lane width / class-padding target


def _round_up(n, m):
    return ((n + m - 1) // m) * m


def simple_nn_kernel(x_ref, w1_ref, b1_ref, w2_ref, b2_ref, out_ref):
    # fc1: [TB, in](bf16) @ [in, 128](bf16) -> f32 accumulate, + bias, ReLU.
    h = jnp.dot(x_ref[...], w1_ref[...], preferred_element_type=jnp.float32)
    h = jnp.maximum(h + b1_ref[...], 0.0)
    # fc2: [TB, 128](bf16) @ [128, C_pad](bf16) -> f32 accumulate, + bias.
    y = jnp.dot(h.astype(jnp.bfloat16), w2_ref[...],
                preferred_element_type=jnp.float32)
    out_ref[...] = (y + b2_ref[...]).astype(out_ref.dtype)


def prepare_params(w1, b1, w2, b2):
    """One-time parameter prep (call once, not per forward).

    Takes PyTorch nn.Linear-convention params:
      w1: [128, input_size], b1: [128], w2: [num_classes, 128], b2: [num_classes]
    Returns kernel-layout params: weights as [in, out] bf16, biases as
    [1, out] f32, with the class dim zero-padded up to a multiple of 128.
    """
    hidden, _ = w1.shape
    num_classes = w2.shape[0]
    c_pad = _round_up(num_classes, LANE)

    w1_t = w1.T.astype(jnp.bfloat16)                      # [in, 128]
    b1_r = b1.reshape(1, hidden).astype(jnp.float32)      # [1, 128]

    w2_t = jnp.zeros((hidden, c_pad), jnp.bfloat16)
    w2_t = w2_t.at[:, :num_classes].set(w2.T.astype(jnp.bfloat16))
    b2_r = jnp.zeros((1, c_pad), jnp.float32)
    b2_r = b2_r.at[:, :num_classes].set(b2.astype(jnp.float32))

    return (w1_t, b1_r, w2_t, b2_r), num_classes


@functools.partial(jax.jit, static_argnames=("num_classes", "tb"))
def simple_nn_forward(x, params, num_classes, tb=128):
    """x: [B, input_size] (any float dtype). params from prepare_params()."""
    w1_t, b1_r, w2_t, b2_r = params
    B, input_size = x.shape
    hidden = w1_t.shape[1]
    c_pad = w2_t.shape[1]

    # Batch tile: multiple of 16 (bf16 sublane packing), default 128 so each
    # MXU pass is row-filled. Pad the batch so the grid divides evenly.
    TB = min(tb, _round_up(B, 16))
    Bp = _round_up(B, TB)

    xb = x.astype(jnp.bfloat16)
    if Bp != B:
        xb = jnp.pad(xb, ((0, Bp - B), (0, 0)))

    out_padded = pl.pallas_call(
        simple_nn_kernel,
        out_shape=jax.ShapeDtypeStruct((Bp, c_pad), jnp.float32),
        grid_spec=pl.GridSpec(
            grid=(Bp // TB,),
            in_specs=[
                pl.BlockSpec((TB, input_size), lambda i: (i, 0)),   # x tile
                pl.BlockSpec((input_size, hidden), lambda i: (0, 0)),  # w1 resident
                pl.BlockSpec((1, hidden), lambda i: (0, 0)),           # b1 resident
                pl.BlockSpec((hidden, c_pad), lambda i: (0, 0)),       # w2 resident
                pl.BlockSpec((1, c_pad), lambda i: (0, 0)),            # b2 resident
            ],
            out_specs=pl.BlockSpec((TB, c_pad), lambda i: (i, 0)),
        ),
        compiler_params=pltpu.CompilerParams(
            dimension_semantics=("parallel",),
        ),
    )(xb, w1_t, b1_r, w2_t, b2_r)

    return out_padded[:B, :num_classes]


if __name__ == "__main__":
    # Small shapes consistent with the module: text features -> 128 -> classes.
    batch = 200          # deliberately not a multiple of the tile (exercises padding)
    input_size = 256
    hidden = 128
    num_classes = 16

    key = jax.random.PRNGKey(0)
    kx, kw1, kb1, kw2, kb2 = jax.random.split(key, 5)

    x = jax.random.normal(kx, (batch, input_size), dtype=jnp.float32)

    # Deterministic parameter init (PyTorch Linear shapes: weight [out, in]).
    bound1 = 1.0 / (input_size ** 0.5)
    w1 = jax.random.uniform(kw1, (hidden, input_size), jnp.float32, -bound1, bound1)
    b1 = jax.random.uniform(kb1, (hidden,), jnp.float32, -bound1, bound1)
    bound2 = 1.0 / (hidden ** 0.5)
    w2 = jax.random.uniform(kw2, (num_classes, hidden), jnp.float32, -bound2, bound2)
    b2 = jax.random.uniform(kb2, (num_classes,), jnp.float32, -bound2, bound2)

    params, n_cls = prepare_params(w1, b1, w2, b2)
    out = simple_nn_forward(x, params, num_classes=n_cls)
    jax.block_until_ready(out)
    assert out.shape == (batch, num_classes)

    # Reference check: mirror the kernel's bf16-input / f32-accumulate math.
    xb = x.astype(jnp.bfloat16).astype(jnp.float32)
    w1b = w1.astype(jnp.bfloat16).astype(jnp.float32)
    w2b = w2.astype(jnp.bfloat16).astype(jnp.float32)
    h_ref = jnp.maximum(xb @ w1b.T + b1, 0.0)
    h_ref = h_ref.astype(jnp.bfloat16).astype(jnp.float32)
    ref = h_ref @ w2b.T + b2
    assert jnp.allclose(out, ref, atol=2e-3, rtol=2e-3), (
        float(jnp.max(jnp.abs(out - ref))))

    print("KERNEL_OK")
</pallas_src>

<mosaic_0001>
module attributes {stable_mosaic.version = 11 : i64} {
  func.func @simple_nn_kernel(%arg0: i32, %arg1: memref<128x256xbf16, #tpu.memory_space<vmem>>, %arg2: memref<256x128xbf16, #tpu.memory_space<vmem>>, %arg3: memref<1x128xf32, #tpu.memory_space<vmem>>, %arg4: memref<128x128xbf16, #tpu.memory_space<vmem>>, %arg5: memref<1x128xf32, #tpu.memory_space<vmem>>, %arg6: memref<128x128xf32, #tpu.memory_space<vmem>>) attributes {dimension_semantics = [#tpu.dimension_semantics<parallel>], iteration_bounds = array<i64: 2>, scalar_prefetch = 0 : i64, scratch_operands = 0 : i64, tpu.core_type = #tpu.core_type<tc>, window_params = [{transform_indices = @transform_0, window_bounds = array<i64: 128, 256>}, {pipeline_mode = #tpu.pipeline_mode<synchronous>, transform_indices = @transform_1, window_bounds = array<i64: 256, 128>}, {pipeline_mode = #tpu.pipeline_mode<synchronous>, transform_indices = @transform_2, window_bounds = array<i64: 1, 128>}, {pipeline_mode = #tpu.pipeline_mode<synchronous>, transform_indices = @transform_3, window_bounds = array<i64: 128, 128>}, {pipeline_mode = #tpu.pipeline_mode<synchronous>, transform_indices = @transform_4, window_bounds = array<i64: 1, 128>}, {transform_indices = @transform_5, window_bounds = array<i64: 128, 128>}]} {
    %c0 = arith.constant 0 : index
    %c0_0 = arith.constant 0 : index
    %0 = vector.load %arg1[%c0, %c0_0] : memref<128x256xbf16, #tpu.memory_space<vmem>>, vector<128x256xbf16>
    %c0_1 = arith.constant 0 : index
    %c0_2 = arith.constant 0 : index
    %1 = vector.load %arg2[%c0_1, %c0_2] : memref<256x128xbf16, #tpu.memory_space<vmem>>, vector<256x128xbf16>
    %cst = arith.constant dense<0.000000e+00> : vector<128x128xf32>
    %2 = tpu.matmul %0, %1, %cst {dimension_numbers = #tpu.dot_dimension_numbers<[1], [0], [0], [1], [0, 0, 1, 1], [], []>} : vector<128x256xbf16>, vector<256x128xbf16>, vector<128x128xf32> -> vector<128x128xf32>
    %c0_3 = arith.constant 0 : index
    %c0_4 = arith.constant 0 : index
    %3 = vector.load %arg3[%c0_3, %c0_4] : memref<1x128xf32, #tpu.memory_space<vmem>>, vector<1x128xf32>
    %4 = vector.broadcast %3 : vector<1x128xf32> to vector<128x128xf32>
    %5 = arith.addf %2, %4 : vector<128x128xf32>
    %cst_5 = arith.constant 0.000000e+00 : f32
    %6 = vector.broadcast %cst_5 : f32 to vector<128x128xf32>
    %7 = arith.maximumf %5, %6 : vector<128x128xf32>
    %8 = arith.truncf %7 : vector<128x128xf32> to vector<128x128xbf16>
    %c0_6 = arith.constant 0 : index
    %c0_7 = arith.constant 0 : index
    %9 = vector.load %arg4[%c0_6, %c0_7] : memref<128x128xbf16, #tpu.memory_space<vmem>>, vector<128x128xbf16>
    %cst_8 = arith.constant dense<0.000000e+00> : vector<128x128xf32>
    %10 = tpu.matmul %8, %9, %cst_8 {dimension_numbers = #tpu.dot_dimension_numbers<[1], [0], [0], [1], [0, 0, 1, 1], [], []>} : vector<128x128xbf16>, vector<128x128xbf16>, vector<128x128xf32> -> vector<128x128xf32>
    %c0_9 = arith.constant 0 : index
    %c0_10 = arith.constant 0 : index
    %11 = vector.load %arg5[%c0_9, %c0_10] : memref<1x128xf32, #tpu.memory_space<vmem>>, vector<1x128xf32>
    %12 = vector.broadcast %11 : vector<1x128xf32> to vector<128x128xf32>
    %13 = arith.addf %10, %12 : vector<128x128xf32>
    %c0_11 = arith.constant 0 : index
    %c0_12 = arith.constant 0 : index
    %14 = vector.load %arg6[%c0_11, %c0_12] : memref<128x128xf32, #tpu.memory_space<vmem>>, vector<128x128xf32>
    tpu.vector_store %arg6[%c0_11, %c0_12], %13 {strides = array<i32>} : memref<128x128xf32, #tpu.memory_space<vmem>>, vector<128x128xf32>,
    return
  }
  func.func @transform_0(%arg0: i32) -> (i32, i32) {
    %c0_i32 = arith.constant 0 : i32
    %c0_i32_0 = arith.constant 0 : i32
    return %arg0, %c0_i32 : i32, i32
  }
  func.func @transform_1(%arg0: i32) -> (i32, i32) {
    %c0_i32 = arith.constant 0 : i32
    %c0_i32_0 = arith.constant 0 : i32
    %c0_i32_1 = arith.constant 0 : i32
    return %c0_i32, %c0_i32_0 : i32, i32
  }
  func.func @transform_2(%arg0: i32) -> (i32, i32) {
    %c0_i32 = arith.constant 0 : i32
    %c0_i32_0 = arith.constant 0 : i32
    %c0_i32_1 = arith.constant 0 : i32
    return %c0_i32, %c0_i32_0 : i32, i32
  }
  func.func @transform_3(%arg0: i32) -> (i32, i32) {
    %c0_i32 = arith.constant 0 : i32
    %c0_i32_0 = arith.constant 0 : i32
    %c0_i32_1 = arith.constant 0 : i32
    return %c0_i32, %c0_i32_0 : i32, i32
  }
  func.func @transform_4(%arg0: i32) -> (i32, i32) {
    %c0_i32 = arith.constant 0 : i32
    %c0_i32_0 = arith.constant 0 : i32
    %c0_i32_1 = arith.constant 0 : i32
    return %c0_i32, %c0_i32_0 : i32, i32
  }
  func.func @transform_5(%arg0: i32) -> (i32, i32) {
    %c0_i32 = arith.constant 0 : i32
    %c0_i32_0 = arith.constant 0 : i32
    return %arg0, %c0_i32 : i32, i32
  }
}

</mosaic_0001>

<bundles_post_ra>
// kernel: simple_nn_forward.1
= control target key start
LH: loop header
LB: loop body
LE: loop exit
PB: predicated region body
PF: predicated region fallthrough
CT: control target
= control target key end

     0   :  { %s1055_s18 = smov 0   ;;  %s1227_s0 = inlined_call_operand.vmem [shape: bf16[256,256], index: 0, kind: input, shape index: {}]   ;;  %s1228_s1 = inlined_call_operand.vmem [shape: bf16[256,128], index: 1, kind: input, shape index: {}]   ;;  %s1229_s2 = inlined_call_operand.vmem [shape: f32[1,128], index: 2, kind: input, shape index: {}]   ;;  %s1230_s3 = inlined_call_operand.vmem [shape: bf16[128,128], index: 3, kind: input, shape index: {}]   ;;  %s1231_s4 = inlined_call_operand.vmem [shape: f32[1,128], index: 4, kind: input, shape index: {}]   ;;  %s1232_s5 = inlined_call_operand.vmem [shape: f32[256,128], index: 5, kind: output, shape index: {}]  }
   0x1 LB: > { %s770_s19 = sadd.s32 4294967295, %s1023_s18   ;;  %p774_p0 = scmp.ge.s32.totalorder %s1023_s18, 1  ;;  %s1023_s18 = sphi %s1055_s18, %s15_s18  }
   0x2   : > { %p189_p1 = scmp.lt.s32.totalorder %s1023_s18, 3 }
   0x4   : > { %p190_p2 = pnand %p774_p0, %p189_p1 }
   0x5   : > { %s775_s7 = sshll.u32 (!%p190_p2), %s770_s19, 4 }
   0x6   : > { %193 = sbr.rel (%p190_p2) target bundleno = 408 (0x198), region = 40  ;;  %p219_p3 = scmp.lt.s32.totalorder (!%p190_p2), %s775_s7, 31 }
   0xb   : > { %v966_v0 = vld [vmem:[%s1228_s1 + $0x38] sm:$0xff]  ;;  %v965_v2 = vld [vmem:[%s1228_s1 + $0x30] sm:$0xff]  ;;  %v964_v4 = vld [vmem:[%s1228_s1 + $0x28] sm:$0xff]  ;;  %s1234_s7 = smov (!%p219_p3, %s775_s7), 31 }
   0xc   : > { %v974_v1 = vld [vmem:[%s1228_s1 + $0x78] sm:$0xff]  ;;  %459 = vmatpush.bf16.msra.mxu0 %v966_v0  ;;  %983 = vmatpush.bf16.msra.mxu3 %v966_v0  ;;  %v973_v3 = vld [vmem:[%s1228_s1 + $0x70] sm:$0xff]  ;;  %v972_v5 = vld [vmem:[%s1228_s1 + $0x68] sm:$0xff]  ;;  %s942_s21 = sshll.u32 %s1234_s7, 3 }
   0xd   : > { %508 = vmatpush.bf16.msra.mxu1 %v974_v1  ;;  %v963_v6 = vld [vmem:[%s1228_s1 + $0x20] sm:$0xff]  ;;  %v962_v8 = vld [vmem:[%s1228_s1 + $0x18] sm:$0xff]  ;;  %v961_v10 = vld [vmem:[%s1228_s1 + $0x10] sm:$0xff]  ;;  %s1110_s26 = scalar_lea.vmem %s1227_s0, %s942_s21  ;;  %s1206_s9 = scalar_lea.vmem %s1232_s5, %s942_s21 }
   0xe   : > { %v971_v7 = vld [vmem:[%s1228_s1 + $0x60] sm:$0xff]  ;;  %v970_v9 = vld [vmem:[%s1228_s1 + $0x58] sm:$0xff]  ;;  %v969_v11 = vld [vmem:[%s1228_s1 + $0x50] sm:$0xff] }
   0xf   : > { %v960_v12 = vld [vmem:[%s1228_s1 + $0x8] sm:$0xff]  ;;  %v959_v14 = vld [vmem:[%s1228_s1] sm:$0xff]  ;;  %v790_v25 = vld [vmem:[%s1110_s26 + $0x10] sm:$0xf] }
  0x10   : > { %460 = vmatpush.bf16.msra.mxu0 %v965_v2  ;;  %984 = vmatpush.bf16.msra.mxu3 %v965_v2  ;;  %v968_v13 = vld [vmem:[%s1228_s1 + $0x48] sm:$0xff]  ;;  %v782_v15 = vld [vmem:[%s1110_s26] sm:$0xf]  ;;  %v943_v20 = vld [vmem:[%s1110_s26 + $0x4] sm:$0xf] }
  0x11   : > { %509 = vmatpush.bf16.msra.mxu1 %v973_v3  ;;  %v944_v16 = vld [vmem:[%s1110_s26 + $0x4] sm:$0xf0]  ;;  %v830_v17 = vld [vmem:[%s1110_s26 + $0x60] sm:$0xf]  ;;  %v784_v21 = vld [vmem:[%s1110_s26 + $0x8] sm:$0xf0] }
  0x12   : > { %v956_v18 = vld [vmem:[%s1110_s26 + $0x64] sm:$0xf0]  ;;  %v967_v19 = vld [vmem:[%s1228_s1 + $0x40] sm:$0xff]  ;;  %v783_v22 = vor.u32 %v944_v16, %v782_v15  ;;  %v787_v24 = vor.u32 %v943_v20, %v784_v21  ;;  %v946_v26 = vld [vmem:[%s1110_s26 + $0x14] sm:$0xf0] }
  0x13   : > { %v831_v23 = vor.u32 %v956_v18, %v830_v17  ;;  %v838_v27 = vld [vmem:[%s1110_s26 + $0x70] sm:$0xf]  ;;  %v958_v28 = vld [vmem:[%s1110_s26 + $0x74] sm:$0xf0]  ;;  %v945_v29 = vld [vmem:[%s1110_s26 + $0x14] sm:$0xf]  ;;  %v791_v31 = vor.u32 %v946_v26, %v790_v25 }
  0x14   : > { %461 = vmatpush.bf16.msra.mxu0 %v964_v4  ;;  %985 = vmatpush.bf16.msra.mxu3 %v964_v4  ;;  %v792_v30 = vld [vmem:[%s1110_s26 + $0x18] sm:$0xf0]  ;;  %v839_v32 = vor.u32 %v958_v28, %v838_v27  ;;  %v798_v34 = vld [vmem:[%s1110_s26 + $0x20] sm:$0xf]  ;;  %v948_v35 = vld [vmem:[%s1110_s26 + $0x24] sm:$0xf0] }
  0x15   : > { %510 = vmatpush.bf16.msra.mxu1 %v972_v5  ;;  %v795_v33 = vor.u32 %v945_v29, %v792_v30  ;;  %v955_v36 = vld [vmem:[%s1110_s26 + $0x64] sm:$0xf]  ;;  %v832_v37 = vld [vmem:[%s1110_s26 + $0x68] sm:$0xf0]  ;;  %v799_v40 = vor.u32 %v948_v35, %v798_v34  ;;  %v806_v43 = vld [vmem:[%s1110_s26 + $0x30] sm:$0xf] }
  0x16   : > { %v947_v38 = vld [vmem:[%s1110_s26 + $0x24] sm:$0xf]  ;;  %v800_v39 = vld [vmem:[%s1110_s26 + $0x28] sm:$0xf0]  ;;  %v835_v41 = vor.u32 %v955_v36, %v832_v37  ;;  %v950_v44 = vld [vmem:[%s1110_s26 + $0x34] sm:$0xf0] }
  0x17   : > { %v803_v42 = vor.u32 %v947_v38, %v800_v39  ;;  %v957_v45 = vld [vmem:[%s1110_s26 + $0x74] sm:$0xf]  ;;  %v840_v46 = vld [vmem:[%s1110_s26 + $0x78] sm:$0xf0]  ;;  %v807_v49 = vor.u32 %v950_v44, %v806_v43  ;;  %v980_v54 = vld [vmem:[%s1230_s3 + $0x28] sm:$0xff] }
  0x18   : > { %462 = vmatpush.bf16.msra.mxu0 %v963_v6  ;;  %986 = vmatpush.bf16.msra.mxu3 %v963_v6  ;;  %v949_v47 = vld [vmem:[%s1110_s26 + $0x34] sm:$0xf]  ;;  %v808_v48 = vld [vmem:[%s1110_s26 + $0x38] sm:$0xf0]  ;;  %v843_v50 = vor.u32 %v957_v45, %v840_v46  ;;  %v814_v55 = vld [vmem:[%s1110_s26 + $0x40] sm:$0xf] }
  0x19   : > { %511 = vmatpush.bf16.msra.mxu1 %v971_v7  ;;  %v811_v51 = vor.u32 %v949_v47, %v808_v48  ;;  %v982_v52 = vld [vmem:[%s1230_s3 + $0x38] sm:$0xff]  ;;  %v981_v53 = vld [vmem:[%s1230_s3 + $0x30] sm:$0xff]  ;;  %v952_v56 = vld [vmem:[%s1110_s26 + $0x44] sm:$0xf0] }
  0x1a   : > { %649 = vmatpush.bf16.msra.mxu2 %v982_v52  ;;  %v951_v57 = vld [vmem:[%s1110_s26 + $0x44] sm:$0xf]  ;;  %v816_v58 = vld [vmem:[%s1110_s26 + $0x48] sm:$0xf0]  ;;  %v815_v60 = vor.u32 %v952_v56, %v814_v55  ;;  %v822_v62 = vld [vmem:[%s1110_s26 + $0x50] sm:$0xf] }
  0x1b   : > { %v979_v59 = vld [vmem:[%s1230_s3 + $0x20] sm:$0xff]  ;;  %v819_v61 = vor.u32 %v951_v57, %v816_v58  ;;  %v954_v63 = vld [vmem:[%s1110_s26 + $0x54] sm:$0xf0]  ;;  %v953_v0 = vld [vmem:[%s1110_s26 + $0x54] sm:$0xf] }
  0x1c   : > { %463 = vmatpush.bf16.msra.mxu0 %v962_v8  ;;  %987 = vmatpush.bf16.msra.mxu3 %v962_v8  ;;  %v823_v2 = vor.u32 %v954_v63, %v822_v62  ;;  %v978_v4 = vld [vmem:[%s1230_s3 + $0x18] sm:$0xff]  ;;  %v976_v6 = vld [vmem:[%s1230_s3 + $0x8] sm:$0xff] }
  0x1d   : > { %512 = vmatpush.bf16.msra.mxu1 %v970_v9 }
  0x1e   : > { %650 = vmatpush.bf16.msra.mxu2 %v981_v53 }
  0x20   : > { %464 = vmatpush.bf16.msra.mxu0 %v961_v10  ;;  %988 = vmatpush.bf16.msra.mxu3 %v961_v10 }
  0x21   : > { %513 = vmatpush.bf16.msra.mxu1 %v969_v11 }
  0x22   : > { %651 = vmatpush.bf16.msra.mxu2 %v980_v54 }
  0x24   : > { %465 = vmatpush.bf16.msra.mxu0 %v960_v12  ;;  %989 = vmatpush.bf16.msra.mxu3 %v960_v12 }
  0x25   : > { %514 = vmatpush.bf16.msra.mxu1 %v968_v13 }
  0x26   : > { %652 = vmatpush.bf16.msra.mxu2 %v979_v59 }
  0x28   : > { %466 = vmatpush.bf16.msra.mxu0 %v959_v14  ;;  %990 = vmatpush.bf16.msra.mxu3 %v959_v14 }
  0x29   : > { %515 = vmatpush.bf16.msra.mxu1 %v967_v19 }
  0x2a   : > { %653 = vmatpush.bf16.msra.mxu2 %v978_v4 }
  0x2b   : > { %467 = vmatmul.bf16.vlgmr.msra.gmra.mxu0 %v783_v22  ;;  %497 = vmatmul.bf16.vlgmr.msra.gmra.mxu3 %v831_v23 }
  0x2c   : > { %991 = vmatpush.bf16.msrb.mxu3 %v974_v1  ;;  %516 = vmatmul.bf16.vlgmr.msra.gmra.mxu1 %v787_v24  ;;  %v824_v1 = vld [vmem:[%s1110_s26 + $0x58] sm:$0xf0] }
  0x30   : > { %992 = vmatpush.bf16.msrb.mxu3 %v973_v3  ;;  %v827_v3 = vor.u32 %v953_v0, %v824_v1 }
  0x34   : > { %993 = vmatpush.bf16.msrb.mxu3 %v972_v5  ;;  %v977_v5 = vld [vmem:[%s1230_s3 + $0x10] sm:$0xff] }
  0x35   : > { %654 = vmatpush.bf16.msra.mxu2 %v977_v5 }
  0x38   : > { %994 = vmatpush.bf16.msrb.mxu3 %v971_v7  ;;  %v975_v7 = vld [vmem:[%s1230_s3] sm:$0xff] }
  0x39   : > { %655 = vmatpush.bf16.msra.mxu2 %v976_v6 }
  0x3b   : > { %472 = vmatmul.bf16.gmra.mxu0 %v791_v31  ;;  %502 = vmatmul.bf16.gmra.mxu3 %v839_v32 }
  0x3c   : > { %995 = vmatpush.bf16.msrb.mxu3 %v970_v9  ;;  %521 = vmatmul.bf16.gmra.mxu1 %v795_v33  ;;  %v1180_v9 = vld [vmem:[%s1229_s2] ss:$0 sm:$0xff] }
  0x3d   : > { %656 = vmatpush.bf16.msra.mxu2 %v975_v7 }
  0x40   : > { %996 = vmatpush.bf16.msrb.mxu3 %v969_v11 }
  0x44   : > { %997 = vmatpush.bf16.msrb.mxu3 %v968_v13 }
  0x48   : > { %998 = vmatpush.bf16.msrb.mxu3 %v967_v19 }
  0x4b   : > { %477 = vmatmul.bf16.gmra.mxu0 %v799_v40  ;;  %546 = vmatmul.bf16.vlgmr.msrb.gmra.mxu3 %v835_v41 }
  0x4c   : > { %526 = vmatmul.bf16.gmra.mxu1 %v803_v42  ;;  %999 = vmatpush.bf16.msra.mxu3 %v982_v52 }
  0x50   : > { %1000 = vmatpush.bf16.msra.mxu3 %v981_v53 }
  0x54   : > { %1001 = vmatpush.bf16.msra.mxu3 %v980_v54 }
  0x58   : > { %1002 = vmatpush.bf16.msra.mxu3 %v979_v59 }
  0x5b   : > { %482 = vmatmul.bf16.gmra.mxu0 %v807_v49  ;;  %551 = vmatmul.bf16.gmra.mxu3 %v843_v50 }
  0x5c   : > { %531 = vmatmul.bf16.gmra.mxu1 %v811_v51  ;;  %1003 = vmatpush.bf16.msra.mxu3 %v978_v4 }
  0x60   : > { %1004 = vmatpush.bf16.msra.mxu3 %v977_v5 }
  0x64   : > { %1005 = vmatpush.bf16.msra.mxu3 %v976_v6 }
  0x68   : > { %1006 = vmatpush.bf16.msra.mxu3 %v975_v7 }
  0x6b   : > { %487 = vmatmul.bf16.gmra.mxu0 %v815_v60 }
  0x6c   : > { %536 = vmatmul.bf16.gmra.mxu1 %v819_v61 }
  0x7b   : > { %492 = vmatmul.bf16.gmra.mxu0 %v823_v2 }
  0x7c   : > { %541 = vmatmul.bf16.gmra.mxu1 %v827_v3 }
  0xa8   : > { %v468_v8 = vpop.f32.mrf.mxu0 }
  0xa9   : > { %v517_v10 = vpop.f32.mrf.mxu1  ;;  %v469_v11 = vadd.f32 %v1180_v9, %v468_v8 }
  0xab   : > { %v518_v14 = vadd.f32 %v517_v10, %v469_v11 }
  0xad   : > { %v557_v18 = vmax.f32 %v518_v14, 0.0 }
  0xae   : > { %v498_v12 = vpop.f32.mrf.mxu3 }
  0xaf   : > { %v499_v43 = vadd.f32 %v1180_v9, %v498_v12 }
  0xb0   : > { %v470_v13 = vpop.f32.mrf.mxu0 }
  0xb1   : > { %v471_v15 = vadd.f32 %v1180_v9, %v470_v13  ;;  %v519_v16 = vpop.f32.mrf.mxu1 }
  0xb3   : > { %v520_v17 = vadd.f32 %v519_v16, %v471_v15 }
  0xb5   : > { %v558_v19 = vmax.f32 %v520_v17, 0.0 }
  0xb6   : > { %v500_v20 = vpop.f32.mrf.mxu3 }
  0xb7   : > { %v573_v21 = vpack.c.bf16 %v558_v19, %v557_v18  ;;  %v501_v45 = vadd.f32 %v1180_v9, %v500_v20 }
  0xb8   : > { %v473_v22 = vpop.f32.mrf.mxu0 }
  0xb9   : > { %v522_v23 = vpop.f32.mrf.mxu1  ;;  %657 = vmatmul.bf16.vlgmr.msra.gmra.mxu2 %v573_v21  ;;  %v474_v24 = vadd.f32 %v1180_v9, %v473_v22 }
  0xbb   : > { %v523_v27 = vadd.f32 %v522_v23, %v474_v24 }
  0xbd   : > { %v559_v31 = vmax.f32 %v523_v27, 0.0 }
  0xbe   : > { %v503_v25 = vpop.f32.mrf.mxu3 }
  0xbf   : > { %v504_v63 = vadd.f32 %v1180_v9, %v503_v25 }
  0xc0   : > { %v475_v26 = vpop.f32.mrf.mxu0 }
  0xc1   : > { %v476_v28 = vadd.f32 %v1180_v9, %v475_v26  ;;  %v524_v29 = vpop.f32.mrf.mxu1 }
  0xc3   : > { %v525_v30 = vadd.f32 %v524_v29, %v476_v28 }
  0xc5   : > { %v560_v32 = vmax.f32 %v525_v30, 0.0 }
  0xc6   : > { %v505_v33 = vpop.f32.mrf.mxu3 }
  0xc7   : > { %v574_v34 = vpack.c.bf16 %v560_v32, %v559_v31  ;;  %v506_v1 = vadd.f32 %v1180_v9, %v505_v33 }
  0xc8   : > { %v478_v35 = vpop.f32.mrf.mxu0 }
  0xc9   : > { %v527_v36 = vpop.f32.mrf.mxu1  ;;  %662 = vmatmul.bf16.gmra.mxu2 %v574_v34  ;;  %v479_v37 = vadd.f32 %v1180_v9, %v478_v35  ;;  %v1016_v34 = vld [vmem:[%s1231_s4] ss:$0 sm:$0xff] }
  0xcb   : > { %v528_v40 = vadd.f32 %v527_v36, %v479_v37 }
  0xcd   : > { %v561_v46 = vmax.f32 %v528_v40, 0.0 }
  0xce   : > { %v547_v38 = vpop.f32.mrf.mxu3 }
  0xcf   : > { %v548_v47 = vadd.f32 %v547_v38, %v499_v43 }
  0xd0   : > { %v480_v39 = vpop.f32.mrf.mxu0 }
  0xd1   : > { %v481_v41 = vadd.f32 %v1180_v9, %v480_v39  ;;  %v529_v42 = vpop.f32.mrf.mxu1  ;;  %v569_v53 = vmax.f32 %v548_v47, 0.0 }
  0xd3   : > { %v530_v44 = vadd.f32 %v529_v42, %v481_v41 }
  0xd5   : > { %v562_v48 = vmax.f32 %v530_v44, 0.0 }
  0xd6   : > { %v549_v49 = vpop.f32.mrf.mxu3 }
  0xd7   : > { %v550_v50 = vadd.f32 %v549_v49, %v501_v45  ;;  %v575_v51 = vpack.c.bf16 %v562_v48, %v561_v46 }
  0xd8   : > { %v483_v52 = vpop.f32.mrf.mxu0 }
  0xd9   : > { %v570_v54 = vmax.f32 %v550_v50, 0.0  ;;  %v532_v55 = vpop.f32.mrf.mxu1  ;;  %667 = vmatmul.bf16.gmra.mxu2 %v575_v51  ;;  %v484_v57 = vadd.f32 %v1180_v9, %v483_v52 }
  0xdb   : > { %v579_v56 = vpack.c.bf16 %v570_v54, %v569_v53  ;;  %v533_v60 = vadd.f32 %v532_v55, %v484_v57 }
  0xdd   : > { %687 = vmatmul.bf16.vlgmr.msra.gmra.mxu3 %v579_v56  ;;  %v563_v2 = vmax.f32 %v533_v60, 0.0 }
  0xde   : > { %v552_v58 = vpop.f32.mrf.mxu3 }
  0xdf   : > { %v553_v3 = vadd.f32 %v552_v58, %v504_v63 }
  0xe0   : > { %v485_v59 = vpop.f32.mrf.mxu0 }
  0xe1   : > { %v486_v61 = vadd.f32 %v1180_v9, %v485_v59  ;;  %v534_v62 = vpop.f32.mrf.mxu1  ;;  %v571_v10 = vmax.f32 %v553_v3, 0.0 }
  0xe3   : > { %v535_v0 = vadd.f32 %v534_v62, %v486_v61 }
  0xe5   : > { %v564_v4 = vmax.f32 %v535_v0, 0.0 }
  0xe6   : > { %v554_v5 = vpop.f32.mrf.mxu3 }
  0xe7   : > { %v555_v6 = vadd.f32 %v554_v5, %v506_v1  ;;  %v576_v7 = vpack.c.bf16 %v564_v4, %v563_v2 }
  0xe8   : > { %v488_v8 = vpop.f32.mrf.mxu0 }
  0xe9   : > { %v572_v11 = vmax.f32 %v555_v6, 0.0  ;;  %v537_v12 = vpop.f32.mrf.mxu1  ;;  %672 = vmatmul.bf16.gmra.mxu2 %v576_v7  ;;  %v489_v14 = vadd.f32 %v1180_v9, %v488_v8 }
  0xeb   : > { %v580_v13 = vpack.c.bf16 %v572_v11, %v571_v10  ;;  %v538_v16 = vadd.f32 %v537_v12, %v489_v14 }
  0xed   : > { %692 = vmatmul.bf16.gmra.mxu3 %v580_v13  ;;  %v565_v20 = vmax.f32 %v538_v16, 0.0 }
  0xf0   : > { %v490_v15 = vpop.f32.mrf.mxu0 }
  0xf1   : > { %v491_v17 = vadd.f32 %v1180_v9, %v490_v15  ;;  %v539_v18 = vpop.f32.mrf.mxu1 }
  0xf3   : > { %v540_v19 = vadd.f32 %v539_v18, %v491_v17 }
  0xf5   : > { %v566_v21 = vmax.f32 %v540_v19, 0.0 }
  0xf7   : > { %v577_v22 = vpack.c.bf16 %v566_v21, %v565_v20 }
  0xf8   : > { %v493_v23 = vpop.f32.mrf.mxu0 }
  0xf9   : > { %v542_v24 = vpop.f32.mrf.mxu1  ;;  %677 = vmatmul.bf16.gmra.mxu2 %v577_v22  ;;  %v494_v25 = vadd.f32 %v1180_v9, %v493_v23 }
  0xfb   : > { %v543_v27 = vadd.f32 %v542_v24, %v494_v25 }
  0xfd   : > { %v567_v31 = vmax.f32 %v543_v27, 0.0 }
 0x100   : > { %v495_v26 = vpop.f32.mrf.mxu0 }
 0x101   : > { %v496_v28 = vadd.f32 %v1180_v9, %v495_v26  ;;  %v544_v29 = vpop.f32.mrf.mxu1 }
 0x103   : > { %v545_v30 = vadd.f32 %v544_v29, %v496_v28 }
 0x105   : > { %v568_v32 = vmax.f32 %v545_v30, 0.0 }
 0x107   : > { %v578_v33 = vpack.c.bf16 %v568_v32, %v567_v31 }
 0x109   : > { %682 = vmatmul.bf16.gmra.mxu2 %v578_v33 }
 0x13c   : > { %v658_v9 = vpop.f32.mrf.mxu2 }
 0x13d   : > { %v659_v35 = vadd.f32 %v1016_v34, %v658_v9 }
 0x13f   : > { %698 = vst [vmem:[%s1206_s9] sm:$0xff] %v659_v35 }
 0x144   : > { %v660_v36 = vpop.f32.mrf.mxu2 }
 0x145   : > { %v661_v37 = vadd.f32 %v1016_v34, %v660_v36 }
 0x147   : > { %699 = vst [vmem:[%s1206_s9 + $0x8] sm:$0xff] %v661_v37 }
 0x14c   : > { %v663_v38 = vpop.f32.mrf.mxu2 }
 0x14d   : > { %v664_v39 = vadd.f32 %v1016_v34, %v663_v38 }
 0x14f   : > { %700 = vst [vmem:[%s1206_s9 + $0x10] sm:$0xff] %v664_v39 }
 0x154   : > { %v665_v40 = vpop.f32.mrf.mxu2 }
 0x155   : > { %v666_v41 = vadd.f32 %v1016_v34, %v665_v40 }
 0x157   : > { %701 = vst [vmem:[%s1206_s9 + $0x18] sm:$0xff] %v666_v41 }
 0x15c   : > { %v668_v42 = vpop.f32.mrf.mxu2 }
 0x15d   : > { %v669_v43 = vadd.f32 %v1016_v34, %v668_v42 }
 0x15f   : > { %702 = vst [vmem:[%s1206_s9 + $0x20] sm:$0xff] %v669_v43 }
 0x160   : > { %v688_v44 = vpop.f32.mrf.mxu3 }
 0x161   : > { %v689_v45 = vadd.f32 %v1016_v34, %v688_v44 }
 0x163   : > { %710 = vst [vmem:[%s1206_s9 + $0x60] sm:$0xff] %v689_v45 }
 0x164   : > { %v670_v46 = vpop.f32.mrf.mxu2 }
 0x165   : > { %v671_v47 = vadd.f32 %v1016_v34, %v670_v46 }
 0x167   : > { %703 = vst [vmem:[%s1206_s9 + $0x28] sm:$0xff] %v671_v47 }
 0x168   : > { %v690_v48 = vpop.f32.mrf.mxu3 }
 0x169   : > { %v691_v49 = vadd.f32 %v1016_v34, %v690_v48 }
 0x16b   : > { %711 = vst [vmem:[%s1206_s9 + $0x68] sm:$0xff] %v691_v49 }
 0x16c   : > { %v673_v50 = vpop.f32.mrf.mxu2 }
 0x16d   : > { %v674_v51 = vadd.f32 %v1016_v34, %v673_v50 }
 0x16f   : > { %704 = vst [vmem:[%s1206_s9 + $0x30] sm:$0xff] %v674_v51 }
 0x170   : > { %v693_v52 = vpop.f32.mrf.mxu3 }
 0x171   : > { %v694_v53 = vadd.f32 %v1016_v34, %v693_v52 }
 0x173   : > { %712 = vst [vmem:[%s1206_s9 + $0x70] sm:$0xff] %v694_v53 }
 0x174   : > { %v675_v54 = vpop.f32.mrf.mxu2 }
 0x175   : > { %v676_v55 = vadd.f32 %v1016_v34, %v675_v54 }
 0x177   : > { %705 = vst [vmem:[%s1206_s9 + $0x38] sm:$0xff] %v676_v55 }
 0x178   : > { %v695_v56 = vpop.f32.mrf.mxu3 }
 0x179   : > { %v696_v57 = vadd.f32 %v1016_v34, %v695_v56 }
 0x17b   : > { %713 = vst [vmem:[%s1206_s9 + $0x78] sm:$0xff] %v696_v57 }
 0x17c   : > { %v678_v58 = vpop.f32.mrf.mxu2 }
 0x17d   : > { %v679_v59 = vadd.f32 %v1016_v34, %v678_v58 }
 0x17f   : > { %706 = vst [vmem:[%s1206_s9 + $0x40] sm:$0xff] %v679_v59 }
 0x184   : > { %v680_v60 = vpop.f32.mrf.mxu2 }
 0x185   : > { %v681_v61 = vadd.f32 %v1016_v34, %v680_v60 }
 0x187   : > { %707 = vst [vmem:[%s1206_s9 + $0x48] sm:$0xff] %v681_v61 }
 0x18c   : > { %v683_v62 = vpop.f32.mrf.mxu2 }
 0x18d   : > { %v684_v63 = vadd.f32 %v1016_v34, %v683_v62 }
 0x18f   : > { %708 = vst [vmem:[%s1206_s9 + $0x50] sm:$0xff] %v684_v63 }
 0x194   : > { %v685_v0 = vpop.f32.mrf.mxu2 }
 0x195   : > { %v686_v1 = vadd.f32 %v1016_v34, %v685_v0 }
 0x197   : > { %709 = vst [vmem:[%s1206_s9 + $0x58] sm:$0xff] %v686_v1 }
 0x198 PF: > { %s15_s18 = sadd.s32 1, %s1023_s18  }
 0x199   : > { %p12_p4 = scmp.ge.s32.totalorder %s15_s18, 4  }
 0x19b   :  { %14 = sbr.rel (!%p12_p4) target bundleno = 1 (0x1), region = 70 }

</bundles_post_ra>
